<compile_context>
chip_gen: v7x
topology: tpu7x:2x2x1
jax: 0.10.0
libtpu: 0.0.40
codegen_flags: <defaults>
</compile_context>

<pallas_src>
import functools
import math

import jax
import jax.numpy as jnp
from jax.experimental import pallas as pl
from jax.experimental.pallas import tpu as pltpu


def _round_up(n, m):
    return ((n + m - 1) // m) * m


def _vmem_capacity_bytes():
    """Physical VMEM of the local chip (v5e/v6e: 128 MiB, v7x: 64 MiB per TC);
    conservative fallback if the query is unavailable."""
    try:
        cap = int(pltpu.get_tpu_info().vmem_capacity_bytes)
        if cap > 0:
            return cap
    except Exception:
        pass
    return 64 * 1024 * 1024


def _vmem_needed(ts, oc, d, u_rows, vy_pad, out_elt):
    """Conservative VMEM footprint of one grid step: double-buffered I/O tiles,
    the resident (single-buffered) U slab, the persistent x@U scratch and the
    transient f32 matmul results before the bf16 cast."""
    lane = 128
    out_tiles = 2 * oc * ts * _round_up(ts, lane) * out_elt  # 2 output buffers
    dot2_f32 = oc * ts * _round_up(ts, lane) * 4             # f32 before cast
    x_tiles = 2 * ts * _round_up(d, lane) * 4                # raw f32 x, 2 bufs
    y_tiles = 2 * ts * vy_pad * 2                            # bf16 y, 2 bufs
    u_block = u_rows * oc * vy_pad * 2                       # single-buffered
    tmp = oc * ts * vy_pad * 2                               # persistent scratch
    dot1_f32 = ts * vy_pad * 4                               # f32 before cast
    slack = 2 * 1024 * 1024                                  # compiler scratch
    return (out_tiles + dot2_f32 + x_tiles + y_tiles + u_block + tmp
            + dot1_f32 + slack)


def _pick_tiles(s, o, d, u_rows, vy_pad, out_elt, budget):
    """Largest MXU-friendly (seq tile, channels-per-group) fitting `budget`.
    Bigger ts is preferred over bigger oc (pipeline efficiency on the output
    writeback dominates); channel-tiling U keeps ts large when o*d is big,
    which matters most on v7x's 64 MiB VMEM."""
    ts_cands = [t for t in (512, 256, 128) if s % t == 0] or [s]
    # TODO(synk): when s has no 128-aligned divisor we fall back to ts=s; for
    # large irregular s, pad s to a multiple of 128 upstream instead.
    oc_cands = [c for c in range(o, 0, -1) if o % c == 0]
    for ts in ts_cands:
        for oc in oc_cands:
            if _vmem_needed(ts, oc, d, u_rows, vy_pad, out_elt) <= budget:
                return ts, oc
    return ts_cands[-1], 1


def _pad_with_bias(t, bias, v_pad):
    """[b, s, d] float -> bf16 [b, s, v_pad]: features, ones col at d, zeros."""
    b, s, d = t.shape
    parts = [t.astype(jnp.bfloat16)]
    if bias:
        parts.append(jnp.ones((b, s, 1), jnp.bfloat16))
    extra = v_pad - d - int(bias)
    if extra > 0:
        parts.append(jnp.zeros((b, s, extra), jnp.bfloat16))
    return jnp.concatenate(parts, axis=-1) if len(parts) > 1 else parts[0]


def prepare_biaffine_u(U, input_dim, bias_x=True, bias_y=True):
    """One-time (parameter-init-time) re-layout of U.

    [vx, o, vy] f32  ->  bf16 [round_up(vx, 8), o * round_up(vy, 128)],
    zero-padded so padded lanes of y contract against zeros.  Not a
    per-forward cost."""
    vx, o, vy = U.shape
    assert vx == input_dim + int(bias_x) and vy == input_dim + int(bias_y)
    u_rows = _round_up(vx, 8)
    vy_pad = _round_up(vy, 128)
    U_pad = jnp.zeros((u_rows, o, vy_pad), jnp.bfloat16)
    U_pad = U_pad.at[:vx, :, :vy].set(U.astype(jnp.bfloat16))
    return U_pad.reshape(u_rows, o * vy_pad)


def biaffine_kernel(x_ref, u_ref, y_ref, out_ref, tmp_ref, *,
                    d, oc, vy_pad, bias_x):
    """One (batch, q-tile, channel-group, k-tile) grid step.

    x_ref  : [ts_q, d]            f32   raw x tile (no bias col, no padding)
    u_ref  : [u_rows, oc*vy_pad]  bf16  channel-group slab of the prepared U
    y_ref  : [ts_k, vy_pad]       bf16  pre-padded y tile (ones col at d)
    out_ref: [oc, ts_q, ts_k]     bf16  lane-dense output tile
    tmp_ref: [oc, ts_q, vy_pad]   bf16  persistent scratch: (x @ U_c) per chan
    """
    # ---- cold path: recompute x @ U once per (batch, q-tile, channel-group);
    # ---- reused across every k-tile (k is the innermost grid axis).
    @pl.when(pl.program_id(3) == 0)
    def _():
        xb = x_ref[...].astype(jnp.bfloat16)          # VPU cast, amortized here
        for c in range(oc):                           # oc is small & static
            lo = c * vy_pad
            t = jax.lax.dot_general(                  # [ts_q, vy_pad] f32
                xb, u_ref[:d, lo:lo + vy_pad],
                dimension_numbers=(((1,), (0,)), ((), ())),
                preferred_element_type=jnp.float32)
            if bias_x:
                # x's ones column contributes U's row d as an additive bias.
                t = t + u_ref[d:d + 1, lo:lo + vy_pad].astype(jnp.float32)
            # TODO(synk): tmp is kept bf16 (same as the MXU inputs); for very
            # large d an f32 scratch is more faithful to the f32 torch
            # intermediate at the cost of 2x scratch + f32 MXU input rate.
            tmp_ref[c] = t.astype(jnp.bfloat16)

    # ---- hot path: ONE fused MXU launch covering all oc channels.
    oc_, ts_q, vyp = tmp_ref.shape
    tmp = tmp_ref[...].reshape(oc_ * ts_q, vyp)        # free leading collapse
    out = jax.lax.dot_general(                         # A.B^T, no y transpose
        tmp, y_ref[...],
        dimension_numbers=(((1,), (1,)), ((), ())),
        preferred_element_type=jnp.float32)            # [oc*ts_q, ts_k] f32
    out_ref[...] = out.astype(out_ref.dtype).reshape(out_ref.shape)


def biaffine_forward(x, y, U_prep, *, input_dim, output_dim,
                     bias_x=True, bias_y=True, out_dtype=jnp.bfloat16,
                     channels_last=True):
    """Biaffine forward.

    x, y   : [b, s, d] float; U_prep : prepare_biaffine_u(U).
    Returns [b, s, s, o] when channels_last=True (PyTorch layout parity; costs
    one extra bf16 transpose pass), or the lane-dense [b, o, s, s] when
    channels_last=False (recommended fast path: zero extra HBM traffic; fuse
    the layout change into the consumer instead)."""
    b, s, d = x.shape
    assert d == input_dim and y.shape == x.shape
    o = output_dim
    u_rows = _round_up(d + int(bias_x), 8)
    vy_pad = _round_up(d + int(bias_y), 128)
    assert U_prep.shape == (u_rows, o * vy_pad), U_prep.shape
    out_elt = jnp.dtype(out_dtype).itemsize

    # y only: one-time bf16 + bias-column pad (y tiles are re-read once per
    # q-tile, and 2*vy_pad B/row bf16 is cheaper to re-read than 4*d B/row f32;
    # x is read raw in-kernel since each x tile is fetched exactly once).
    y_p = _pad_with_bias(y, bias_y, vy_pad)            # [b, s, vy_pad] bf16

    # Generation-aware tiling: fit everything in a fraction of this chip's
    # physical VMEM, and raise the scoped limit accordingly.
    cap = _vmem_capacity_bytes()
    budget = (cap * 3) // 4
    ts, oc = _pick_tiles(s, o, d, u_rows, vy_pad, out_elt, budget)
    nq, nk, noc = s // ts, s // ts, o // oc
    vmem_limit = min(int(cap * 0.9), 127 * 1024 * 1024)

    flops = int(2 * b * s * d * o * vy_pad             # x @ U (amortized)
                + 2 * b * o * s * s * vy_pad)          # (xU) @ y^T
    bytes_accessed = int(b * s * d * 4                 # raw x
                         + nq * b * s * vy_pad * 2     # y tiles, re-read per q
                         + u_rows * o * vy_pad * 2     # resident U
                         + b * o * s * s * out_elt)    # output writeback
    cost = pl.CostEstimate(flops=flops, transcendentals=0,
                           bytes_accessed=bytes_accessed)

    kern = functools.partial(biaffine_kernel, d=d, oc=oc, vy_pad=vy_pad,
                             bias_x=bias_x)

    def build(u_single_buffered):
        # U slab: index map ignores (qi, ki); with noc == 1 it is constant, so
        # a second pipeline buffer is pure VMEM waste -> pl.Buffered(1).
        u_kwargs = ({"pipeline_mode": pl.Buffered(1)}
                    if (u_single_buffered and noc == 1) else {})
        u_spec = pl.BlockSpec((u_rows, oc * vy_pad),
                              lambda bi, qi, ci, ki: (0, ci), **u_kwargs)
        return pl.pallas_call(
            kern,
            out_shape=jax.ShapeDtypeStruct((b, o, s, s), out_dtype),
            grid_spec=pltpu.PrefetchScalarGridSpec(
                num_scalar_prefetch=0,
                grid=(b, nq, noc, nk),
                in_specs=[
                    # raw x[b, q-tile]: [ts, d] f32 (fetched once per (b, q))
                    pl.BlockSpec((None, ts, d),
                                 lambda bi, qi, ci, ki: (bi, qi, 0)),
                    u_spec,
                    # padded y[b, k-tile]: [ts, vy_pad] bf16
                    pl.BlockSpec((None, ts, vy_pad),
                                 lambda bi, qi, ci, ki: (bi, ki, 0)),
                ],
                out_specs=pl.BlockSpec((None, oc, ts, ts),
                                       lambda bi, qi, ci, ki: (bi, ci, qi, ki)),
                scratch_shapes=[pltpu.VMEM((oc, ts, vy_pad), jnp.bfloat16)],
            ),
            compiler_params=pltpu.CompilerParams(
                # b / q / channel-group shard across TensorCores (v7x has 2);
                # k is "arbitrary" because the x@U scratch is reused across it.
                dimension_semantics=("parallel", "parallel", "parallel",
                                     "arbitrary"),
                vmem_limit_bytes=vmem_limit),
            cost_estimate=cost,
        )

    try:
        out_boss = build(True)(x, U_prep, y_p)
    except Exception:
        # pl.Buffered(1) unsupported on this jax version -> default buffering.
        out_boss = build(False)(x, U_prep, y_p)

    if not channels_last:
        return out_boss                    # lane-dense [b, o, s, s] fast path
    # PyTorch layout parity only; bf16 transpose is half the bytes of the old
    # f32 one.  Prefer channels_last=False and fuse this into the consumer.
    return jnp.transpose(out_boss, (0, 2, 3, 1))


if __name__ == "__main__":
    # Small shapes consistent with the module's forward.
    batch, seq, input_dim, output_dim = 2, 8, 32, 4
    bias_x = bias_y = True
    vx = input_dim + int(bias_x)
    vy = input_dim + int(bias_y)

    key = jax.random.PRNGKey(0)
    kx, ky, ku = jax.random.split(key, 3)

    x = jax.random.normal(kx, (batch, seq, input_dim), dtype=jnp.float32)
    y = jax.random.normal(ky, (batch, seq, input_dim), dtype=jnp.float32)

    # Deterministic xavier_normal_ equivalent for U of shape [vx, o, vy]:
    # PyTorch fan_in = o * vy, fan_out = vx * vy (receptive field = trailing).
    fan_in = output_dim * vy
    fan_out = vx * vy
    std = math.sqrt(2.0 / (fan_in + fan_out))
    U = std * jax.random.normal(ku, (vx, output_dim, vy), dtype=jnp.float32)

    # One-time parameter re-layout (init-time, not per-forward).
    U_prep = prepare_biaffine_u(U, input_dim, bias_x=bias_x, bias_y=bias_y)

    # Fast path: lane-dense [b, o, s, s] bf16, no layout pass.
    out_boss = biaffine_forward(x, y, U_prep, input_dim=input_dim,
                                output_dim=output_dim, bias_x=bias_x,
                                bias_y=bias_y, channels_last=False)
    out_boss = jax.block_until_ready(out_boss)
    assert out_boss.shape == (batch, output_dim, seq, seq)

    # PyTorch-layout parity path ([b, s, s, o]).
    out = biaffine_forward(x, y, U_prep, input_dim=input_dim,
                           output_dim=output_dim, bias_x=bias_x, bias_y=bias_y,
                           channels_last=True)
    out = jax.block_until_ready(out)
    assert out.shape == (batch, seq, seq, output_dim)
    assert jnp.allclose(out.astype(jnp.float32),
                        jnp.transpose(out_boss, (0, 2, 3, 1)).astype(jnp.float32),
                        atol=1e-6, rtol=0.0)

    # Reference: same math as torch.einsum, with inputs rounded to bf16 (the
    # kernel's MXU input dtype), f32 accumulation, and the output rounded to
    # bf16 like the kernel's writeback.
    xb = jnp.concatenate([x, jnp.ones_like(x[..., :1])], axis=-1)
    yb = jnp.concatenate([y, jnp.ones_like(y[..., :1])], axis=-1)
    xb = xb.astype(jnp.bfloat16).astype(jnp.float32)
    yb = yb.astype(jnp.bfloat16).astype(jnp.float32)
    Ub = U.astype(jnp.bfloat16).astype(jnp.float32)
    ref = jnp.einsum('bxi,ioj,byj->bxyo', xb, Ub, yb,
                     precision=jax.lax.Precision.HIGHEST)
    ref = ref.astype(jnp.bfloat16).astype(jnp.float32)

    err = float(jnp.max(jnp.abs(out.astype(jnp.float32) - ref)))
    assert jnp.allclose(out.astype(jnp.float32), ref, atol=4e-2, rtol=4e-2), err
    print("KERNEL_OK")
</pallas_src>

<mosaic_0001>
module attributes {stable_mosaic.version = 11 : i64} {
  func.func @biaffine_kernel(%arg0: i32, %arg1: i32, %arg2: i32, %arg3: i32, %arg4: memref<1x8x32xf32, #tpu.memory_space<vmem>>, %arg5: memref<40x512xbf16, #tpu.memory_space<vmem>>, %arg6: memref<1x8x128xbf16, #tpu.memory_space<vmem>>, %arg7: memref<1x4x8x8xbf16, #tpu.memory_space<vmem>>, %arg8: memref<4x8x128xbf16, #tpu.memory_space<vmem>>) attributes {dimension_semantics = [#tpu.dimension_semantics<parallel>, #tpu.dimension_semantics<parallel>, #tpu.dimension_semantics<parallel>, #tpu.dimension_semantics<arbitrary>], iteration_bounds = array<i64: 2, 1, 1, 1>, scalar_prefetch = 0 : i64, scratch_operands = 1 : i64, tpu.core_type = #tpu.core_type<tc>, window_params = [{transform_indices = @transform_0, window_bounds = array<i64: 1, 8, 32>}, {pipeline_mode = #tpu.pipeline_mode<synchronous>, transform_indices = @transform_1, window_bounds = array<i64: 40, 512>}, {transform_indices = @transform_2, window_bounds = array<i64: 1, 8, 128>}, {transform_indices = @transform_3, window_bounds = array<i64: 1, 4, 8, 8>}]} {
    %c0_i32 = arith.constant 0 : i32
    %0 = arith.cmpi eq, %arg3, %c0_i32 : i32
    %1 = arith.extui %0 : i1 to i32
    %c0_i32_0 = arith.constant 0 : i32
    %2 = arith.cmpi ne, %1, %c0_i32_0 : i32
    scf.if %2 {
      %c0_10 = arith.constant 0 : index
      %c0_11 = arith.constant 0 : index
      %c0_12 = arith.constant 0 : index
      %13 = vector.load %arg4[%c0_10, %c0_11, %c0_12] : memref<1x8x32xf32, #tpu.memory_space<vmem>>, vector<1x8x32xf32>
      %14 = vector.shape_cast %13 : vector<1x8x32xf32> to vector<8x32xf32>
      %15 = arith.truncf %14 : vector<8x32xf32> to vector<8x32xbf16>
      %c0_13 = arith.constant 0 : index
      %c0_14 = arith.constant 0 : index
      %16 = vector.load %arg5[%c0_13, %c0_14] : memref<40x512xbf16, #tpu.memory_space<vmem>>, vector<32x128xbf16>
      %cst_15 = arith.constant dense<0.000000e+00> : vector<8x128xf32>
      %17 = tpu.matmul %15, %16, %cst_15 {dimension_numbers = #tpu.dot_dimension_numbers<[1], [0], [0], [1], [0, 0, 1, 1], [], []>} : vector<8x32xbf16>, vector<32x128xbf16>, vector<8x128xf32> -> vector<8x128xf32>
      %c32 = arith.constant 32 : index
      %c0_16 = arith.constant 0 : index
      %18 = vector.load %arg5[%c32, %c0_16] : memref<40x512xbf16, #tpu.memory_space<vmem>>, vector<1x128xbf16>
      %19 = arith.extf %18 : vector<1x128xbf16> to vector<1x128xf32>
      %20 = vector.broadcast %19 : vector<1x128xf32> to vector<8x128xf32>
      %21 = arith.addf %17, %20 : vector<8x128xf32>
      %22 = arith.truncf %21 : vector<8x128xf32> to vector<8x128xbf16>
      %c0_17 = arith.constant 0 : index
      %c0_18 = arith.constant 0 : index
      %c0_19 = arith.constant 0 : index
      %23 = vector.load %arg8[%c0_17, %c0_18, %c0_19] : memref<4x8x128xbf16, #tpu.memory_space<vmem>>, vector<1x8x128xbf16>
      %24 = vector.shape_cast %23 : vector<1x8x128xbf16> to vector<8x128xbf16>
      %25 = vector.shape_cast %22 : vector<8x128xbf16> to vector<1x8x128xbf16>
      tpu.vector_store %arg8[%c0_17, %c0_18, %c0_19], %25 {strides = array<i32>} : memref<4x8x128xbf16, #tpu.memory_space<vmem>>, vector<1x8x128xbf16>,
      %c0_20 = arith.constant 0 : index
      %c128 = arith.constant 128 : index
      %26 = vector.load %arg5[%c0_20, %c128] : memref<40x512xbf16, #tpu.memory_space<vmem>>, vector<32x128xbf16>
      %cst_21 = arith.constant dense<0.000000e+00> : vector<8x128xf32>
      %27 = tpu.matmul %15, %26, %cst_21 {dimension_numbers = #tpu.dot_dimension_numbers<[1], [0], [0], [1], [0, 0, 1, 1], [], []>} : vector<8x32xbf16>, vector<32x128xbf16>, vector<8x128xf32> -> vector<8x128xf32>
      %c32_22 = arith.constant 32 : index
      %c128_23 = arith.constant 128 : index
      %28 = vector.load %arg5[%c32_22, %c128_23] : memref<40x512xbf16, #tpu.memory_space<vmem>>, vector<1x128xbf16>
      %29 = arith.extf %28 : vector<1x128xbf16> to vector<1x128xf32>
      %30 = vector.broadcast %29 : vector<1x128xf32> to vector<8x128xf32>
      %31 = arith.addf %27, %30 : vector<8x128xf32>
      %32 = arith.truncf %31 : vector<8x128xf32> to vector<8x128xbf16>
      %c1 = arith.constant 1 : index
      %c0_24 = arith.constant 0 : index
      %c0_25 = arith.constant 0 : index
      %33 = vector.load %arg8[%c1, %c0_24, %c0_25] : memref<4x8x128xbf16, #tpu.memory_space<vmem>>, vector<1x8x128xbf16>
      %34 = vector.shape_cast %33 : vector<1x8x128xbf16> to vector<8x128xbf16>
      %35 = vector.shape_cast %32 : vector<8x128xbf16> to vector<1x8x128xbf16>
      tpu.vector_store %arg8[%c1, %c0_24, %c0_25], %35 {strides = array<i32>} : memref<4x8x128xbf16, #tpu.memory_space<vmem>>, vector<1x8x128xbf16>,
      %c0_26 = arith.constant 0 : index
      %c256 = arith.constant 256 : index
      %36 = vector.load %arg5[%c0_26, %c256] : memref<40x512xbf16, #tpu.memory_space<vmem>>, vector<32x128xbf16>
      %cst_27 = arith.constant dense<0.000000e+00> : vector<8x128xf32>
      %37 = tpu.matmul %15, %36, %cst_27 {dimension_numbers = #tpu.dot_dimension_numbers<[1], [0], [0], [1], [0, 0, 1, 1], [], []>} : vector<8x32xbf16>, vector<32x128xbf16>, vector<8x128xf32> -> vector<8x128xf32>
      %c32_28 = arith.constant 32 : index
      %c256_29 = arith.constant 256 : index
      %38 = vector.load %arg5[%c32_28, %c256_29] : memref<40x512xbf16, #tpu.memory_space<vmem>>, vector<1x128xbf16>
      %39 = arith.extf %38 : vector<1x128xbf16> to vector<1x128xf32>
      %40 = vector.broadcast %39 : vector<1x128xf32> to vector<8x128xf32>
      %41 = arith.addf %37, %40 : vector<8x128xf32>
      %42 = arith.truncf %41 : vector<8x128xf32> to vector<8x128xbf16>
      %c2 = arith.constant 2 : index
      %c0_30 = arith.constant 0 : index
      %c0_31 = arith.constant 0 : index
      %43 = vector.load %arg8[%c2, %c0_30, %c0_31] : memref<4x8x128xbf16, #tpu.memory_space<vmem>>, vector<1x8x128xbf16>
      %44 = vector.shape_cast %43 : vector<1x8x128xbf16> to vector<8x128xbf16>
      %45 = vector.shape_cast %42 : vector<8x128xbf16> to vector<1x8x128xbf16>
      tpu.vector_store %arg8[%c2, %c0_30, %c0_31], %45 {strides = array<i32>} : memref<4x8x128xbf16, #tpu.memory_space<vmem>>, vector<1x8x128xbf16>,
      %c0_32 = arith.constant 0 : index
      %c384 = arith.constant 384 : index
      %46 = vector.load %arg5[%c0_32, %c384] : memref<40x512xbf16, #tpu.memory_space<vmem>>, vector<32x128xbf16>
      %cst_33 = arith.constant dense<0.000000e+00> : vector<8x128xf32>
      %47 = tpu.matmul %15, %46, %cst_33 {dimension_numbers = #tpu.dot_dimension_numbers<[1], [0], [0], [1], [0, 0, 1, 1], [], []>} : vector<8x32xbf16>, vector<32x128xbf16>, vector<8x128xf32> -> vector<8x128xf32>
      %c32_34 = arith.constant 32 : index
      %c384_35 = arith.constant 384 : index
      %48 = vector.load %arg5[%c32_34, %c384_35] : memref<40x512xbf16, #tpu.memory_space<vmem>>, vector<1x128xbf16>
      %49 = arith.extf %48 : vector<1x128xbf16> to vector<1x128xf32>
      %50 = vector.broadcast %49 : vector<1x128xf32> to vector<8x128xf32>
      %51 = arith.addf %47, %50 : vector<8x128xf32>
      %52 = arith.truncf %51 : vector<8x128xf32> to vector<8x128xbf16>
      %c3 = arith.constant 3 : index
      %c0_36 = arith.constant 0 : index
      %c0_37 = arith.constant 0 : index
      %53 = vector.load %arg8[%c3, %c0_36, %c0_37] : memref<4x8x128xbf16, #tpu.memory_space<vmem>>, vector<1x8x128xbf16>
      %54 = vector.shape_cast %53 : vector<1x8x128xbf16> to vector<8x128xbf16>
      %55 = vector.shape_cast %52 : vector<8x128xbf16> to vector<1x8x128xbf16>
      tpu.vector_store %arg8[%c3, %c0_36, %c0_37], %55 {strides = array<i32>} : memref<4x8x128xbf16, #tpu.memory_space<vmem>>, vector<1x8x128xbf16>,
    } else {
    }
    %c0 = arith.constant 0 : index
    %c0_1 = arith.constant 0 : index
    %c0_2 = arith.constant 0 : index
    %3 = vector.load %arg8[%c0, %c0_1, %c0_2] : memref<4x8x128xbf16, #tpu.memory_space<vmem>>, vector<4x8x128xbf16>
    %4 = vector.shape_cast %3 : vector<4x8x128xbf16> to vector<32x128xbf16>
    %c0_3 = arith.constant 0 : index
    %c0_4 = arith.constant 0 : index
    %c0_5 = arith.constant 0 : index
    %5 = vector.load %arg6[%c0_3, %c0_4, %c0_5] : memref<1x8x128xbf16, #tpu.memory_space<vmem>>, vector<1x8x128xbf16>
    %6 = vector.shape_cast %5 : vector<1x8x128xbf16> to vector<8x128xbf16>
    %cst = arith.constant dense<0.000000e+00> : vector<32x8xf32>
    %7 = tpu.matmul %4, %6, %cst {dimension_numbers = #tpu.dot_dimension_numbers<[1], [1], [0], [0], [0, 0, 1, 0], [], []>} : vector<32x128xbf16>, vector<8x128xbf16>, vector<32x8xf32> -> vector<32x8xf32>
    %8 = arith.truncf %7 : vector<32x8xf32> to vector<32x8xbf16>
    %9 = vector.shape_cast %8 : vector<32x8xbf16> to vector<4x8x8xbf16>
    %c0_6 = arith.constant 0 : index
    %c0_7 = arith.constant 0 : index
    %c0_8 = arith.constant 0 : index
    %c0_9 = arith.constant 0 : index
    %10 = vector.load %arg7[%c0_6, %c0_7, %c0_8, %c0_9] : memref<1x4x8x8xbf16, #tpu.memory_space<vmem>>, vector<1x4x8x8xbf16>
    %11 = vector.shape_cast %10 : vector<1x4x8x8xbf16> to vector<4x8x8xbf16>
    %12 = vector.shape_cast %9 : vector<4x8x8xbf16> to vector<1x4x8x8xbf16>
    tpu.vector_store %arg7[%c0_6, %c0_7, %c0_8, %c0_9], %12 {strides = array<i32>} : memref<1x4x8x8xbf16, #tpu.memory_space<vmem>>, vector<1x4x8x8xbf16>,
    return
  }
  func.func @transform_0(%arg0: i32, %arg1: i32, %arg2: i32, %arg3: i32) -> (i32, i32, i32) {
    %c0_i32 = arith.constant 0 : i32
    %c0_i32_0 = arith.constant 0 : i32
    return %arg0, %arg1, %c0_i32 : i32, i32, i32
  }
  func.func @transform_1(%arg0: i32, %arg1: i32, %arg2: i32, %arg3: i32) -> (i32, i32) {
    %c0_i32 = arith.constant 0 : i32
    %c0_i32_0 = arith.constant 0 : i32
    return %c0_i32, %arg2 : i32, i32
  }
  func.func @transform_2(%arg0: i32, %arg1: i32, %arg2: i32, %arg3: i32) -> (i32, i32, i32) {
    %c0_i32 = arith.constant 0 : i32
    %c0_i32_0 = arith.constant 0 : i32
    return %arg0, %arg3, %c0_i32 : i32, i32, i32
  }
  func.func @transform_3(%arg0: i32, %arg1: i32, %arg2: i32, %arg3: i32) -> (i32, i32, i32, i32) {
    %c0_i32 = arith.constant 0 : i32
    return %arg0, %arg2, %arg1, %arg3 : i32, i32, i32, i32
  }
}

module attributes {stable_mosaic.version = 11 : i64} {
  func.func @biaffine_kernel(%arg0: i32, %arg1: i32, %arg2: i32, %arg3: i32, %arg4: memref<1x8x32xf32, #tpu.memory_space<vmem>>, %arg5: memref<40x512xbf16, #tpu.memory_space<vmem>>, %arg6: memref<1x8x128xbf16, #tpu.memory_space<vmem>>, %arg7: memref<1x4x8x8xbf16, #tpu.memory_space<vmem>>, %arg8: memref<4x8x128xbf16, #tpu.memory_space<vmem>>) attributes {dimension_semantics = [#tpu.dimension_semantics<parallel>, #tpu.dimension_semantics<parallel>, #tpu.dimension_semantics<parallel>, #tpu.dimension_semantics<arbitrary>], iteration_bounds = array<i64: 2, 1, 1, 1>, scalar_prefetch = 0 : i64, scratch_operands = 1 : i64, tpu.core_type = #tpu.core_type<tc>, window_params = [{transform_indices = @transform_0, window_bounds = array<i64: 1, 8, 32>}, {transform_indices = @transform_1, window_bounds = array<i64: 40, 512>}, {transform_indices = @transform_2, window_bounds = array<i64: 1, 8, 128>}, {transform_indices = @transform_3, window_bounds = array<i64: 1, 4, 8, 8>}]} {
    %c0_i32 = arith.constant 0 : i32
    %0 = arith.cmpi eq, %arg3, %c0_i32 : i32
    %1 = arith.extui %0 : i1 to i32
    %c0_i32_0 = arith.constant 0 : i32
    %2 = arith.cmpi ne, %1, %c0_i32_0 : i32
    scf.if %2 {
      %c0_10 = arith.constant 0 : index
      %c0_11 = arith.constant 0 : index
      %c0_12 = arith.constant 0 : index
      %13 = vector.load %arg4[%c0_10, %c0_11, %c0_12] : memref<1x8x32xf32, #tpu.memory_space<vmem>>, vector<1x8x32xf32>
      %14 = vector.shape_cast %13 : vector<1x8x32xf32> to vector<8x32xf32>
      %15 = arith.truncf %14 : vector<8x32xf32> to vector<8x32xbf16>
      %c0_13 = arith.constant 0 : index
      %c0_14 = arith.constant 0 : index
      %16 = vector.load %arg5[%c0_13, %c0_14] : memref<40x512xbf16, #tpu.memory_space<vmem>>, vector<32x128xbf16>
      %cst_15 = arith.constant dense<0.000000e+00> : vector<8x128xf32>
      %17 = tpu.matmul %15, %16, %cst_15 {dimension_numbers = #tpu.dot_dimension_numbers<[1], [0], [0], [1], [0, 0, 1, 1], [], []>} : vector<8x32xbf16>, vector<32x128xbf16>, vector<8x128xf32> -> vector<8x128xf32>
      %c32 = arith.constant 32 : index
      %c0_16 = arith.constant 0 : index
      %18 = vector.load %arg5[%c32, %c0_16] : memref<40x512xbf16, #tpu.memory_space<vmem>>, vector<1x128xbf16>
      %19 = arith.extf %18 : vector<1x128xbf16> to vector<1x128xf32>
      %20 = vector.broadcast %19 : vector<1x128xf32> to vector<8x128xf32>
      %21 = arith.addf %17, %20 : vector<8x128xf32>
      %22 = arith.truncf %21 : vector<8x128xf32> to vector<8x128xbf16>
      %c0_17 = arith.constant 0 : index
      %c0_18 = arith.constant 0 : index
      %c0_19 = arith.constant 0 : index
      %23 = vector.load %arg8[%c0_17, %c0_18, %c0_19] : memref<4x8x128xbf16, #tpu.memory_space<vmem>>, vector<1x8x128xbf16>
      %24 = vector.shape_cast %23 : vector<1x8x128xbf16> to vector<8x128xbf16>
      %25 = vector.shape_cast %22 : vector<8x128xbf16> to vector<1x8x128xbf16>
      tpu.vector_store %arg8[%c0_17, %c0_18, %c0_19], %25 {strides = array<i32>} : memref<4x8x128xbf16, #tpu.memory_space<vmem>>, vector<1x8x128xbf16>,
      %c0_20 = arith.constant 0 : index
      %c128 = arith.constant 128 : index
      %26 = vector.load %arg5[%c0_20, %c128] : memref<40x512xbf16, #tpu.memory_space<vmem>>, vector<32x128xbf16>
      %cst_21 = arith.constant dense<0.000000e+00> : vector<8x128xf32>
      %27 = tpu.matmul %15, %26, %cst_21 {dimension_numbers = #tpu.dot_dimension_numbers<[1], [0], [0], [1], [0, 0, 1, 1], [], []>} : vector<8x32xbf16>, vector<32x128xbf16>, vector<8x128xf32> -> vector<8x128xf32>
      %c32_22 = arith.constant 32 : index
      %c128_23 = arith.constant 128 : index
      %28 = vector.load %arg5[%c32_22, %c128_23] : memref<40x512xbf16, #tpu.memory_space<vmem>>, vector<1x128xbf16>
      %29 = arith.extf %28 : vector<1x128xbf16> to vector<1x128xf32>
      %30 = vector.broadcast %29 : vector<1x128xf32> to vector<8x128xf32>
      %31 = arith.addf %27, %30 : vector<8x128xf32>
      %32 = arith.truncf %31 : vector<8x128xf32> to vector<8x128xbf16>
      %c1 = arith.constant 1 : index
      %c0_24 = arith.constant 0 : index
      %c0_25 = arith.constant 0 : index
      %33 = vector.load %arg8[%c1, %c0_24, %c0_25] : memref<4x8x128xbf16, #tpu.memory_space<vmem>>, vector<1x8x128xbf16>
      %34 = vector.shape_cast %33 : vector<1x8x128xbf16> to vector<8x128xbf16>
      %35 = vector.shape_cast %32 : vector<8x128xbf16> to vector<1x8x128xbf16>
      tpu.vector_store %arg8[%c1, %c0_24, %c0_25], %35 {strides = array<i32>} : memref<4x8x128xbf16, #tpu.memory_space<vmem>>, vector<1x8x128xbf16>,
      %c0_26 = arith.constant 0 : index
      %c256 = arith.constant 256 : index
      %36 = vector.load %arg5[%c0_26, %c256] : memref<40x512xbf16, #tpu.memory_space<vmem>>, vector<32x128xbf16>
      %cst_27 = arith.constant dense<0.000000e+00> : vector<8x128xf32>
      %37 = tpu.matmul %15, %36, %cst_27 {dimension_numbers = #tpu.dot_dimension_numbers<[1], [0], [0], [1], [0, 0, 1, 1], [], []>} : vector<8x32xbf16>, vector<32x128xbf16>, vector<8x128xf32> -> vector<8x128xf32>
      %c32_28 = arith.constant 32 : index
      %c256_29 = arith.constant 256 : index
      %38 = vector.load %arg5[%c32_28, %c256_29] : memref<40x512xbf16, #tpu.memory_space<vmem>>, vector<1x128xbf16>
      %39 = arith.extf %38 : vector<1x128xbf16> to vector<1x128xf32>
      %40 = vector.broadcast %39 : vector<1x128xf32> to vector<8x128xf32>
      %41 = arith.addf %37, %40 : vector<8x128xf32>
      %42 = arith.truncf %41 : vector<8x128xf32> to vector<8x128xbf16>
      %c2 = arith.constant 2 : index
      %c0_30 = arith.constant 0 : index
      %c0_31 = arith.constant 0 : index
      %43 = vector.load %arg8[%c2, %c0_30, %c0_31] : memref<4x8x128xbf16, #tpu.memory_space<vmem>>, vector<1x8x128xbf16>
      %44 = vector.shape_cast %43 : vector<1x8x128xbf16> to vector<8x128xbf16>
      %45 = vector.shape_cast %42 : vector<8x128xbf16> to vector<1x8x128xbf16>
      tpu.vector_store %arg8[%c2, %c0_30, %c0_31], %45 {strides = array<i32>} : memref<4x8x128xbf16, #tpu.memory_space<vmem>>, vector<1x8x128xbf16>,
      %c0_32 = arith.constant 0 : index
      %c384 = arith.constant 384 : index
      %46 = vector.load %arg5[%c0_32, %c384] : memref<40x512xbf16, #tpu.memory_space<vmem>>, vector<32x128xbf16>
      %cst_33 = arith.constant dense<0.000000e+00> : vector<8x128xf32>
      %47 = tpu.matmul %15, %46, %cst_33 {dimension_numbers = #tpu.dot_dimension_numbers<[1], [0], [0], [1], [0, 0, 1, 1], [], []>} : vector<8x32xbf16>, vector<32x128xbf16>, vector<8x128xf32> -> vector<8x128xf32>
      %c32_34 = arith.constant 32 : index
      %c384_35 = arith.constant 384 : index
      %48 = vector.load %arg5[%c32_34, %c384_35] : memref<40x512xbf16, #tpu.memory_space<vmem>>, vector<1x128xbf16>
      %49 = arith.extf %48 : vector<1x128xbf16> to vector<1x128xf32>
      %50 = vector.broadcast %49 : vector<1x128xf32> to vector<8x128xf32>
      %51 = arith.addf %47, %50 : vector<8x128xf32>
      %52 = arith.truncf %51 : vector<8x128xf32> to vector<8x128xbf16>
      %c3 = arith.constant 3 : index
      %c0_36 = arith.constant 0 : index
      %c0_37 = arith.constant 0 : index
      %53 = vector.load %arg8[%c3, %c0_36, %c0_37] : memref<4x8x128xbf16, #tpu.memory_space<vmem>>, vector<1x8x128xbf16>
      %54 = vector.shape_cast %53 : vector<1x8x128xbf16> to vector<8x128xbf16>
      %55 = vector.shape_cast %52 : vector<8x128xbf16> to vector<1x8x128xbf16>
      tpu.vector_store %arg8[%c3, %c0_36, %c0_37], %55 {strides = array<i32>} : memref<4x8x128xbf16, #tpu.memory_space<vmem>>, vector<1x8x128xbf16>,
    } else {
    }
    %c0 = arith.constant 0 : index
    %c0_1 = arith.constant 0 : index
    %c0_2 = arith.constant 0 : index
    %3 = vector.load %arg8[%c0, %c0_1, %c0_2] : memref<4x8x128xbf16, #tpu.memory_space<vmem>>, vector<4x8x128xbf16>
    %4 = vector.shape_cast %3 : vector<4x8x128xbf16> to vector<32x128xbf16>
    %c0_3 = arith.constant 0 : index
    %c0_4 = arith.constant 0 : index
    %c0_5 = arith.constant 0 : index
    %5 = vector.load %arg6[%c0_3, %c0_4, %c0_5] : memref<1x8x128xbf16, #tpu.memory_space<vmem>>, vector<1x8x128xbf16>
    %6 = vector.shape_cast %5 : vector<1x8x128xbf16> to vector<8x128xbf16>
    %cst = arith.constant dense<0.000000e+00> : vector<32x8xf32>
    %7 = tpu.matmul %4, %6, %cst {dimension_numbers = #tpu.dot_dimension_numbers<[1], [1], [0], [0], [0, 0, 1, 0], [], []>} : vector<32x128xbf16>, vector<8x128xbf16>, vector<32x8xf32> -> vector<32x8xf32>
    %8 = arith.truncf %7 : vector<32x8xf32> to vector<32x8xbf16>
    %9 = vector.shape_cast %8 : vector<32x8xbf16> to vector<4x8x8xbf16>
    %c0_6 = arith.constant 0 : index
    %c0_7 = arith.constant 0 : index
    %c0_8 = arith.constant 0 : index
    %c0_9 = arith.constant 0 : index
    %10 = vector.load %arg7[%c0_6, %c0_7, %c0_8, %c0_9] : memref<1x4x8x8xbf16, #tpu.memory_space<vmem>>, vector<1x4x8x8xbf16>
    %11 = vector.shape_cast %10 : vector<1x4x8x8xbf16> to vector<4x8x8xbf16>
    %12 = vector.shape_cast %9 : vector<4x8x8xbf16> to vector<1x4x8x8xbf16>
    tpu.vector_store %arg7[%c0_6, %c0_7, %c0_8, %c0_9], %12 {strides = array<i32>} : memref<1x4x8x8xbf16, #tpu.memory_space<vmem>>, vector<1x4x8x8xbf16>,
    return
  }
  func.func @transform_0(%arg0: i32, %arg1: i32, %arg2: i32, %arg3: i32) -> (i32, i32, i32) {
    %c0_i32 = arith.constant 0 : i32
    %c0_i32_0 = arith.constant 0 : i32
    return %arg0, %arg1, %c0_i32 : i32, i32, i32
  }
  func.func @transform_1(%arg0: i32, %arg1: i32, %arg2: i32, %arg3: i32) -> (i32, i32) {
    %c0_i32 = arith.constant 0 : i32
    %c0_i32_0 = arith.constant 0 : i32
    return %c0_i32, %arg2 : i32, i32
  }
  func.func @transform_2(%arg0: i32, %arg1: i32, %arg2: i32, %arg3: i32) -> (i32, i32, i32) {
    %c0_i32 = arith.constant 0 : i32
    %c0_i32_0 = arith.constant 0 : i32
    return %arg0, %arg3, %c0_i32 : i32, i32, i32
  }
  func.func @transform_3(%arg0: i32, %arg1: i32, %arg2: i32, %arg3: i32) -> (i32, i32, i32, i32) {
    %c0_i32 = arith.constant 0 : i32
    return %arg0, %arg2, %arg1, %arg3 : i32, i32, i32, i32
  }
}

</mosaic_0001>

<bundles_post_ra>
// kernel: tpu_custom_call.1
= control target key start
LH: loop header
LB: loop body
LE: loop exit
PB: predicated region body
PF: predicated region fallthrough
CT: control target
= control target key end

     0   :  { %s1457_s0 = inlined_call_operand.hbm [shape: f32[2,8,32], index: 0, kind: input, shape index: {}]   ;;  %s1458_s1 = inlined_call_operand.hbm [shape: bf16[40,512], index: 1, kind: input, shape index: {}]   ;;  %s1459_s2 = inlined_call_operand.hbm [shape: bf16[2,8,128], index: 2, kind: input, shape index: {}]   ;;  %s1460_s3 = inlined_call_operand.hbm [shape: bf16[2,4,8,8], index: 3, kind: output, shape index: {}]  }
   0x1   :  { %1469 = sst [smem:[#allocation15_spill]] %s1457_s0 }
   0x2   :  { %8 = vsyncpa [#allocation4], 0 }
   0x3   :  { %10 = vsyncpa [#allocation4 + $0x1], 0 }
   0x4   :  { %11 = vsyncpa [#allocation7], 0 }
   0x5   :  { %12 = vsyncpa [#allocation5], 0 }
   0x6   :  { %14 = vsyncpa [#allocation5 + $0x1], 0  ;;  %s1183_s12 = smov 0   ;;  %s1185_s13 = smov 0  }
   0x7   :  { %s1187_s14 = smov 0   ;;  %s1189_s15 = smov 0  }
   0x8   :  { %s1191_s16 = smov 0   ;;  %s1193_s17 = smov 0  }
   0x9 LB: > { %s46_s18 = sadd.s32 1, %s1147_s16  ;;  %s55_s19 = sadd.s32 1, %s1139_s14  ;;  %s1151_s17 = sphi %s1193_s17, %s20_s17   ;;  %s1147_s16 = sphi %s1191_s16, %s1493_s16   ;;  %s1143_s15 = sphi %s1189_s15, %s1492_s15   ;;  %s1139_s14 = sphi %s1187_s14, %s1491_s14   ;;  %s1135_s13 = sphi %s1185_s13, %s1490_s13   ;;  %s1131_s12 = sphi %s1183_s12, %s1489_s12  }
   0xa   : > { %p48_p0 = scmp.ge.s32.totalorder %s46_s18, 2  ;;  %p62_p1 = scmp.ne.s32.totalorder %s1139_s14, %s1135_s13 }
   0xb   : > { %p63_p2 = scmp.eq.s32.totalorder %s1151_s17, 0  ;;  %p905_p5 = scmp.lt.s32.totalorder %s1151_s17, 2 }
   0xc   : > { %s1495_s18 = smov (%p48_p0, %s46_s18), 0  ;;  %s194_s21 = sand.u32 1, %s1151_s17  }
   0xd   : > { %1470 = sst [smem:[#allocation14_spill]] %s1495_s18  ;;  %p64_p4 = por %p63_p2, %p62_p1 }
   0xe   : > { %s50_s20 = ssub.s32 %s1147_s16, %s1495_s18  ;;  %s196_s22 = sand.u32 1, %s1139_s14  }
   0xf   : > { %p53_p6 = scmp.eq.s32.totalorder %s50_s20, 0  ;;  %s790_s23 = sshll.u32 %s1147_s16, 7 }
  0x10   : > { %s789_s25 = sshll.u32 %s196_s22, 3  ;;  %s1471_s0 = sld [smem:[#allocation15_spill]] }
  0x11   : > { %s1231_s24 = scalar_select %p53_p6, %s1139_s14, %s55_s19  }
  0x12   : > { %p1240_p7 = pnand %p905_p5, %p64_p4  ;;  %s198_s30 = scalar_lea.vmem [#allocation3], %s789_s25 }
  0x13   : > { %s206_s4 = sshll.u32 %s198_s30, 4  ;;  %s1246_s5 = scalar_lea.sflag [#allocation4], %s194_s21  ;;  %s1244_s4 = int_to_ptr.vmem [resolvable:$true] %s206_s4 }
  0x14   : > { %s1472_s29 = scalar_select %p1240_p7, 1, 0 }
  0x15   : > { %p1463_p9 = pneg %p1240_p7 }
  0x16   : > { %s1238_s28 = scalar_lea.hbm %s1471_s0, %s790_s23  ;;  %s978_s9 = scalar_lea.hbm %s1471_s0, 256 }
  0x17   : > { %s973_s6 = scalar_lea.hbm %s1238_s28, 128  ;;  %p979_p12 = scmp.lt.u32.totalorder %s1238_s28, %s1471_s0 }
  0x18   : > { %p974_p8 = scmp.ne.s32.totalorder %s1238_s28, %s973_s6  ;;  %p980_p13 = scmp.lt.u32.totalorder %s978_s9, %s973_s6 }
  0x19   : > { %p982_p2 = scmp.lt.u32.totalorder %s973_s6, %s1238_s28 }
  0x1a   : > { %p976_p10 = pnand %p1463_p9, %p974_p8  ;;  %p981_p0 = por %p980_p13, %p979_p12 }
  0x1c   : > { %p977_p11 = pneg %p976_p10  ;;  %p983_p4 = por %p982_p2, %p981_p0 }
  0x1e   : > { %p984_p5 = pnand %p983_p4, %p977_p11 }
  0x20   : > { %987 = shalt.err (!%p984_p5)
}
  0x21   : > { %s988_s19 = scalar_lea.vmem %s1244_s4, 128  ;;  %s1153_s20 = smov [#allocation3]  }
  0x22   : > { %p989_p6 = scmp.ne.s32.totalorder %s1244_s4, %s988_s19  ;;  %s993_s21 = sshll.u32 %s1153_s20, 4  ;;  %s994_s21 = int_to_ptr.vmem [resolvable:$false] %s993_s21 }
  0x23   : > { %s995_s23 = scalar_lea.vmem %s994_s21, 256  ;;  %p996_p3 = scmp.lt.s32.totalorder %s1244_s4, %s994_s21 }
  0x24   : > { %p991_p8 = pnand %p989_p6, %p1463_p9  ;;  %p997_p12 = scmp.lt.s32.totalorder %s995_s23, %s988_s19 }
  0x26   : > { %p992_p10 = pneg %p991_p8  ;;  %p998_p13 = por %p997_p12, %p996_p3 }
  0x28   : > { %p999_p0 = pnand %p998_p13, %p992_p10 }
  0x2a   : > { %1002 = shalt.err (!%p999_p0)
}
  0x2b   : > { %896 = dma.hbm_to_vmem [thread:$0]  (!%p1240_p7), %s1238_s28, 128, %s1244_s4, %s1246_s5  }
  0x2c   : > { %s1275_s25 = sadd.s32 4294967295, %s1151_s17   ;;  %s785_s26 = sadd.s32 4294967294, %s1151_s17  }
  0x2d   : > { %p68_p3 = scmp.ne.s32.totalorder %s1135_s13, %s1131_s12  ;;  %p1462_p11 = scmp.eq.s32.totalorder %s1275_s25, 0 }
  0x2e   : > { %p152_p2 = scmp.eq.s32.totalorder %s1275_s25, 1  ;;  %p158_p4 = scmp.eq.s32.totalorder %s785_s26, 1 }
  0x2f   : > { %p1284_p5 = por %p1462_p11, %p68_p3  ;;  %p786_p6 = scmp.ge.s32.totalorder %s1151_s17, 1 }
  0x30   : > { %p1292_p8 = por %p152_p2, %p62_p1  ;;  %p1296_p10 = por %p158_p4, %p68_p3 }
  0x31   : > { %s1473_s27 = scalar_select %p1284_p5, 1, 0 }
  0x32   : > { %s1474_s28 = scalar_select %p1292_p8, 1, 0 }
  0x33   : > { %s1475_s30 = scalar_select %p1296_p10, 1, 0 }
  0x34   : > { %p165_p12 = scmp.lt.s32.totalorder %s1151_s17, 3  ;;  %s791_s4 = sshll.u32 %s196_s22, 2 }
  0x35   : > { %s1154_s7 = smov [#allocation6]   ;;  %s792_s9 = sshll.u32 %s1147_s16, 6 }
  0x36   : > { %p1303_p13 = pnand %p786_p6, %p165_p12  ;;  %s180_s8 = sshll.u32 %s1154_s7, 4  ;;  %s1307_s8 = int_to_ptr.vmem [resolvable:$true] %s180_s8 }
  0x37   : > { %s217_s10 = scalar_lea.vmem [#allocation8], %s791_s4  ;;  %s1321_s21 = scalar_lea.hbm %s1459_s2, %s792_s9 }
  0x38   : > { %s1476_s6 = scalar_select %p1303_p13, 1, 0 }
  0x39   : > { %p889_p1 = pneg %p1303_p13  ;;  %s225_s11 = sshll.u32 %s217_s10, 4  ;;  %s1323_s11 = int_to_ptr.vmem [resolvable:$true] %s225_s11 }
  0x3a   : > { %s1003_s7 = scalar_lea.hbm %s1458_s1, 1280 }
  0x3b   : > { %p1314_p0 = pnand %p889_p1, %p1462_p11  ;;  %p1004_p3 = scmp.ne.s32.totalorder %s1458_s1, %s1003_s7 }
  0x3c   : > { %p1010_p12 = scmp.lt.u32.totalorder %s1003_s7, %s1458_s1 }
  0x3d   : > { %p1005_p2 = pneg %p1314_p0 }
  0x3f   : > { %p1006_p4 = pnand %p1005_p2, %p1004_p3 }
  0x41   : > { %p1007_p6 = pneg %p1006_p4 }
  0x43   : > { %p1012_p1 = pnand %p1010_p12, %p1007_p6 }
  0x45   : > { %1015 = shalt.err (!%p1012_p1)
}
  0x46   : > { %s1016_s9 = scalar_lea.vmem %s1307_s8, 1280  ;;  %p1024_p8 = scmp.lt.s32.totalorder %s1307_s8, %s1307_s8 }
  0x47   : > { %p1017_p11 = scmp.ne.s32.totalorder %s1307_s8, %s1016_s9  ;;  %p1025_p5 = scmp.lt.s32.totalorder %s1016_s9, %s1016_s9 }
  0x49   : > { %p1019_p9 = pnand %p1017_p11, %p1005_p2  ;;  %p1026_p13 = por %p1025_p5, %p1024_p8 }
  0x4b   : > { %p1020_p10 = pneg %p1019_p9 }
  0x4d   : > { %p1027_p7 = pnand %p1026_p13, %p1020_p10 }
  0x4f   : > { %1030 = shalt.err (!%p1027_p7)
}
  0x50   : > { %s1155_s0 = smov 256   ;;  %s1156_s18 = smov 16  }
  0x51   : > { %892 = dma.hbm_to_vmem [thread:$0]  (!%p1314_p0), %s1458_s1, 1280, %s1307_s8, [#allocation7], %s1155_s0, %s1155_s0, %s1156_s18  }
  0x52   : > { %s1031_s23 = scalar_lea.hbm %s1321_s21, 64  ;;  %p1478_p11 = scmp.ne.s32.totalorder %s1472_s29, 0 }
  0x53   : > { %p1032_p9 = scmp.ne.s32.totalorder %s1321_s21, %s1031_s23  ;;  %s1036_s4 = scalar_lea.hbm %s1459_s2, 128 }
  0x54   : > { %p1479_p5 = pneg %p1478_p11  ;;  %p1037_p10 = scmp.lt.u32.totalorder %s1321_s21, %s1459_s2 }
  0x55   : > { %p1038_p13 = scmp.lt.u32.totalorder %s1036_s4, %s1031_s23  ;;  %p1040_p2 = scmp.lt.u32.totalorder %s1031_s23, %s1321_s21 }
  0x56   : > { %p1034_p8 = pnand %p1032_p9, %p1479_p5 }
  0x57   : > { %p1039_p3 = por %p1038_p13, %p1037_p10 }
  0x58   : > { %p1035_p7 = pneg %p1034_p8 }
  0x59   : > { %p1041_p4 = por %p1040_p2, %p1039_p3 }
  0x5b   : > { %p1042_p6 = pnand %p1041_p4, %p1035_p7 }
  0x5d   : > { %1045 = shalt.err (!%p1042_p6)
}
  0x5e   : > { %s1046_s8 = scalar_lea.vmem %s1323_s11, 64  ;;  %p1480_p12 = pmov %p1479_p5 }
  0x5f   : > { %p1047_p0 = scmp.ne.s32.totalorder %s1323_s11, %s1046_s8  ;;  %s1157_s19 = smov [#allocation8]  }
  0x60   : > { %s1051_s0 = sshll.u32 %s1157_s19, 4  ;;  %s1052_s0 = int_to_ptr.vmem [resolvable:$false] %s1051_s0 }
  0x61   : > { %p1049_p1 = pnand %p1047_p0, %p1480_p12  ;;  %s1053_s18 = scalar_lea.vmem %s1052_s0, 128 }
  0x62   : > { %p1054_p5 = scmp.lt.s32.totalorder %s1323_s11, %s1052_s0  ;;  %p1055_p8 = scmp.lt.s32.totalorder %s1053_s18, %s1046_s8 }
  0x63   : > { %p1050_p9 = pneg %p1049_p1 }
  0x64   : > { %p1056_p10 = por %p1055_p8, %p1054_p5 }
  0x66   : > { %p1057_p13 = pnand %p1056_p10, %p1050_p9 }
  0x68   : > { %1060 = shalt.err (!%p1057_p13)
}
  0x69   : > { %899 = dma.hbm_to_vmem [thread:$0]  (!%p1478_p11), %s1321_s21, 64, %s1323_s11, %s1246_s5  }
  0x6a   : > { %p1481_p7 = scmp.ne.s32.totalorder %s1476_s6, 0 }
  0x6b   : > { %s236_s22 = sand.u32 (!%p1481_p7), 1, %s1275_s25   ;;  %s1374_s20 = sand.u32 (!%p1481_p7), 1, %s1135_s13  }
  0x6c   : > { %234 = sbr.rel (%p1481_p7) target bundleno = 596 (0x254), region = 32  ;;  %s794_s23 = sshll.u32 (!%p1481_p7), %s1374_s20, 3 }
  0x6d   : > { %s237_s26 = scalar_lea.sflag (!%p1481_p7), [#allocation4], %s236_s22  ;;  %s240_s7 = scalar_lea.vmem (!%p1481_p7), [#allocation3], %s794_s23 }
  0x6e   : > { %p1482_p3 = scmp.ne.s32.totalorder (!%p1481_p7), %s1473_s27, 0 }
  0x73   : > { %1114 = dma.done.wait (%p1482_p3), %s237_s26, 128  }
  0x74   : > { %1116 = vsyncadd (%p1482_p3), %s237_s26, 4294967168  ;;  %p1483_p11 = scmp.eq.s32.totalorder %s1275_s25, 0 }
  0x76   : > { %1118 = dma.done.wait (%p1483_p11), [#allocation7], 1280   ;;  %p1484_p2 = pmov %p1483_p11 }
  0x77   : > { %s796_s29 = sshll.u32 %s1374_s20, 2 }
  0x78   : > { %1120 = vsyncadd (%p1484_p2), [#allocation7], 4294966016  ;;  %s1386_s5 = scalar_lea.vmem [#allocation8], %s796_s29 }
  0x79   : > { %1122 = dma.done.wait (%p1482_p3), %s237_s26, 64  }
  0x7a   : > { %1124 = vsyncadd (%p1482_p3), %s237_s26, 4294967232  ;;  %v1158_v0 = vmov 0.0   ;;  %vm1159_vm0 = vmmov 0   ;;  %v963_v1 = vld [vmem:[#allocation6] ss:$16 sps:$4 sm:$0xff]   ;;  %vm312_vm1 = vcmask 261120   ;;  %v296_v12 = vlaneseq }
  0x7b   : > { %841 = vmatprep.subr.bf16.mxu0 %v1158_v0  ;;  %849 = vmatprep.subr.bf16.mxu1 %v1158_v0  ;;  %v964_v2 = vld [vmem:[#allocation6 + $0x4] ss:$16 sps:$4 sm:$0xff]   ;;  %v965_v3 = vld [vmem:[#allocation6 + $0x20] ss:$16 sps:$4 sm:$0xff]   ;;  %v967_v7 = vld [vmem:[#allocation6 + $0x8] ss:$16 sps:$4 sm:$0xff]  }
  0x7c   : > { %845 = vmatprep.mubr.msk.bf16.mxu0 %vm1159_vm0, %v1158_v0  ;;  %853 = vmatprep.mubr.msk.bf16.mxu1 %vm1159_vm0, %v1158_v0  ;;  %v966_v4 = vld [vmem:[#allocation6 + $0x24] ss:$16 sps:$4 sm:$0xff]   ;;  %v968_v8 = vld [vmem:[#allocation6 + $0xc] ss:$16 sps:$4 sm:$0xff]   ;;  %v969_v9 = vld [vmem:[#allocation6 + $0x28] ss:$16 sps:$4 sm:$0xff]  }
  0x7d   : > { %842 = vmatpush3.bf16.msra.mxu0 %v963_v1  ;;  %850 = vmatpush3.bf16.msra.mxu1 %v964_v2  ;;  %v288_v5 = vld [vmem:[%s240_s7] sm:$0xff]  ;;  %v297_v13 = vshrl.u32 %v296_v12, 7  ;;  %v294_v14 = vld [vmem:[#allocation6 + $0x40] sm:$0x1]  ;;  %v362_v15 = vld [vmem:[#allocation6 + $0x44] sm:$0x1] }
  0x7e   : > { %843 = vmatprep.subr.bf16.mxu0 %v1158_v0  ;;  %851 = vmatprep.subr.bf16.mxu1 %v1158_v0  ;;  %v289_v6 = vpack.c.bf16 %v288_v5, %v288_v5  ;;  %v970_v10 = vld [vmem:[#allocation6 + $0x2c] ss:$16 sps:$4 sm:$0xff]   ;;  %v557_v11 = vld [vmem:[%s1386_s5] sm:$0xf]  ;;  %v295_v16 = vunpack.c.l.bf16 %v294_v14  ;;  %v363_v18 = vunpack.c.l.bf16 %v362_v15  ;;  %v427_v21 = vld [vmem:[#allocation6 + $0x48] sm:$0x1] }
  0x7f   : > { %v298_v17 = vsub.s32 0, %v297_v13  ;;  %v492_v22 = vld [vmem:[#allocation6 + $0x4c] sm:$0x1]  ;;  %v428_v27 = vunpack.c.l.bf16 %v427_v21  ;;  %s797_s25 = sshll.u32 %s1374_s20, 4  ;;  %vm635_vm2 = vcmask 60416   ;;  %s825_s11 = sshll.u32 %s1143_s15, 8 }
  0x80   : > { %v493_v31 = vunpack.c.l.bf16 %v492_v22  ;;  %s280_s27 = scalar_lea.vmem [#allocation9], %s797_s25  ;;  %s1408_s10 = scalar_lea.hbm %s1460_s3, %s825_s11 }
  0x81   : > { %844 = vmatpush3.bf16.msra.mxu0 %v965_v3  ;;  %852 = vmatpush3.bf16.msra.mxu1 %v966_v4  ;;  %v299_v19 = vrot.slane %v295_v16, %v298_v17  ;;  %v367_v20 = vrot.slane %v363_v18, %v298_v17  ;;  %v432_v37 = vrot.slane %v428_v27, %v298_v17  ;;  %s658_s6 = sshll.u32 %s280_s27, 4  ;;  %s641_s15 = scalar_lea.sflag [#allocation5], %s1374_s20  ;;  %s1403_s6 = int_to_ptr.vmem [resolvable:$true] %s658_s6 }
  0x82   : > { %857 = vmatprep.subr.bf16.mxu0 %v1158_v0  ;;  %865 = vmatprep.subr.bf16.mxu1 %v1158_v0  ;;  %v497_v38 = vrot.slane %v493_v31, %v298_v17  ;;  %s1061_s9 = scalar_lea.vmem %s1403_s6, 256  ;;  %p1485_p6 = scmp.ne.s32.totalorder %s1474_s28, 0 }
  0x83   : > { %p1062_p4 = scmp.ne.s32.totalorder %s1403_s6, %s1061_s9  ;;  %s1160_s8 = smov [#allocation9]  }
  0x84   : > { %846 = vmatmul.mubr.msk.bf16.vlgmr.msra.gmra.mrb[0].mxu0 %vm312_vm1, %v289_v6  ;;  %854 = vmatmul.mubr.msk.bf16.vlgmr.msra.gmra.mrb[0].mxu1 %vm312_vm1, %v289_v6  ;;  %s1065_s19 = sshll.u32 %s1160_s8, 4  ;;  %s1066_s19 = int_to_ptr.vmem [resolvable:$false] %s1065_s19 }
  0x85   : > { %858 = vmatpush3.bf16.msra.mxu0 %v967_v7  ;;  %866 = vmatpush3.bf16.msra.mxu1 %v968_v8  ;;  %p1063_p0 = pnand %p1062_p4, %p1485_p6  ;;  %s1067_s0 = scalar_lea.vmem %s1066_s19, 512 }
  0x86   : > { %859 = vmatprep.subr.bf16.mxu0 %v1158_v0  ;;  %867 = vmatprep.subr.bf16.mxu1 %v1158_v0  ;;  %p1068_p1 = scmp.lt.s32.totalorder %s1403_s6, %s1066_s19  ;;  %p1069_p9 = scmp.lt.s32.totalorder %s1067_s0, %s1061_s9 }
  0x87   : > { %861 = vmatprep.mubr.msk.bf16.mxu0 %vm1159_vm0, %v1158_v0  ;;  %869 = vmatprep.mubr.msk.bf16.mxu1 %vm1159_vm0, %v1158_v0  ;;  %p1064_p12 = pneg %p1063_p0 }
  0x88   : > { %p1070_p5 = por %p1069_p9, %p1068_p1 }
  0x89   : > { %860 = vmatpush3.bf16.msra.mxu0 %v969_v9  ;;  %868 = vmatpush3.bf16.msra.mxu1 %v970_v10 }
  0x8a   : > { %873 = vmatprep.subr.bf16.mxu0 %v557_v11  ;;  %p1071_p8 = pnand %p1070_p5, %p1064_p12 }
  0x8c   : > { %862 = vmatmul.mubr.msk.bf16.vlgmr.msra.gmra.mrb[4].mxu0 %vm312_vm1, %v289_v6  ;;  %870 = vmatmul.mubr.msk.bf16.vlgmr.msra.gmra.mrb[4].mxu1 %vm312_vm1, %v289_v6 }
  0x92   : > { %874 = vmatpush3.bf16.xpose.msra.mxu0 %v557_v11 }
 0x157   : > { %v350_v23 = vpop.f32.mrb[0].mxu0  ;;  %v414_v25 = vpop.f32.mrb[0].mxu1 }
 0x158   : > { %v351_v24 = vadd.f32 %v350_v23, %v299_v19  ;;  %v847_v26 = vpop.f32.mrb[1].mxu0  ;;  %v415_v28 = vadd.f32 %v414_v25, %v367_v20  ;;  %v855_v29 = vpop.f32.mrb[1].mxu1 }
 0x159   : > { %v353_v30 = vpop.f32.mrb[2].mxu0  ;;  %v417_v33 = vpop.f32.mrb[2].mxu1 }
 0x15a   : > { %v356_v32 = vpack.c.bf16 %v351_v24, %v351_v24  ;;  %v848_v34 = vpop.f32.mrb[3].mxu0  ;;  %v420_v35 = vpack.c.bf16 %v415_v28, %v415_v28  ;;  %v856_v36 = vpop.f32.mrb[3].mxu1 }
 0x15c   : > { %357 = vst [vmem:[#allocation2] sm:$0xf] %v356_v32  ;;  %422 = vst [vmem:[#allocation2 + $0x4] sm:$0xf] %v420_v35 }
 0x15f   : > { %v479_v39 = vpop.f32.mrb[4].mxu0  ;;  %v544_v41 = vpop.f32.mrb[4].mxu1 }
 0x160   : > { %v480_v40 = vadd.f32 %v479_v39, %v432_v37  ;;  %v863_v42 = vpop.f32.mrb[5].mxu0  ;;  %v545_v43 = vadd.f32 %v544_v41, %v497_v38  ;;  %v871_v44 = vpop.f32.mrb[5].mxu1 }
 0x161   : > { %v482_v45 = vpop.f32.mrb[6].mxu0  ;;  %v547_v47 = vpop.f32.mrb[6].mxu1 }
 0x162   : > { %v485_v46 = vpack.c.bf16 %v480_v40, %v480_v40  ;;  %v864_v48 = vpop.f32.mrb[7].mxu0  ;;  %v550_v49 = vpack.c.bf16 %v545_v43, %v545_v43  ;;  %v872_v50 = vpop.f32.mrb[7].mxu1 }
 0x163   : > { %v971_v51 = vld [vmem:[#allocation2] sm:$0xff]  }
 0x164   : > { %487 = vst [vmem:[#allocation2 + $0x8] sm:$0xf] %v485_v46  ;;  %552 = vst [vmem:[#allocation2 + $0xc] sm:$0xf] %v550_v49  ;;  %875 = vmatprep.mubr.bf16.mxu0 %v971_v51 }
 0x16b   : > { %v972_v52 = vld [vmem:[#allocation2 + $0x8] sm:$0xff]  }
 0x16c   : > { %876 = vmatmul.mubr.bf16.vlgmr.msra.gmra.mrb[8].mxu0 %v972_v52 }
 0x23f   : > { %v877_v53 = vpop.f32.mrb[8].mxu0 }
 0x240   : > { %v823_v54 = vpack.c.bf16 %v877_v53, %v877_v53  ;;  %v604_v55 = vpop.f32.mrb[9].mxu0 }
 0x241   : > { %v821_v56 = vpack.c.bf16 %v604_v55, %v604_v55  ;;  %v878_v57 = vpop.f32.mrb[10].mxu0 }
 0x242   : > { %638 = vst.msk [vmem:[%s280_s27 + $0x8] sm:$0xf] %vm635_vm2, %v823_v54  ;;  %v824_v58 = vpack.c.bf16 %v878_v57, %v878_v57  ;;  %v607_v59 = vpop.f32.mrb[11].mxu0 }
 0x243   : > { %636 = vst.msk [vmem:[%s280_s27] sm:$0xf] %vm635_vm2, %v821_v56  ;;  %v822_v60 = vpack.c.bf16 %v607_v59, %v607_v59 }
 0x244   : > { %639 = vst.msk [vmem:[%s280_s27 + $0xc] sm:$0xf] %vm635_vm2, %v824_v58 }
 0x245   : > { %637 = vst.msk [vmem:[%s280_s27 + $0x4] sm:$0xf] %vm635_vm2, %v822_v60 }
 0x246   : > { %1074 = shalt.err (!%p1071_p8)
}
 0x247   : > { %s1075_s18 = scalar_lea.hbm %s1408_s10, 256  ;;  %s1079_s26 = scalar_lea.hbm %s1460_s3, 512 }
 0x248   : > { %p1076_p10 = scmp.ne.s32.totalorder %s1408_s10, %s1075_s18  ;;  %p1080_p3 = scmp.lt.u32.totalorder %s1408_s10, %s1460_s3 }
 0x249   : > { %p1081_p11 = scmp.lt.u32.totalorder %s1079_s26, %s1075_s18  ;;  %p1083_p4 = scmp.lt.u32.totalorder %s1075_s18, %s1408_s10 }
 0x24a   : > { %p1077_p13 = pnand %p1076_p10, %p1485_p6 }
 0x24b   : > { %p1082_p2 = por %p1081_p11, %p1080_p3 }
 0x24c   : > { %p1078_p7 = pneg %p1077_p13 }
 0x24d   : > { %p1084_p0 = por %p1083_p4, %p1082_p2 }
 0x24f   : > { %p1085_p12 = pnand %p1084_p0, %p1078_p7 }
 0x251   : > { %1088 = shalt.err (!%p1085_p12)
}
 0x252   : > { %s1161_s5 = smov 64   ;;  %s1162_s25 = smov 4  }
 0x253   : > { %887 = dma.vmem_to_hbm [thread:$0]  (%p1485_p6), %s1403_s6, 256, %s1408_s10, %s641_s15, %s1161_s5, %s1161_s5, %s1162_s25  }
 0x254 PF: > { %s673_s27 = sand.u32 1, %s1131_s12   ;;  %p1486_p1 = scmp.ne.s32.totalorder %s1475_s30, 0 }
 0x255   : > { %p1487_p9 = scmp.ge.s32.totalorder %s1151_s17, 2  ;;  %s674_s11 = scalar_lea.sflag [#allocation5], %s673_s27 }
 0x257   : > { %p901_p5 = pnand %p1487_p9, %p1486_p1 }
 0x259   : > { %1126 = dma.done.wait (!%p901_p5), %s674_s11, 256  }
 0x25a   : > { %1128 = vsyncadd (!%p901_p5), %s674_s11, 4294967040  ;;  %s20_s17 = sadd.s32 1, %s1151_s17   ;;  %s1488_s28 = sld [smem:[#allocation14_spill]] }
 0x25b   : > { %p17_p8 = scmp.ge.s32.totalorder %s20_s17, 4   ;;  %s1489_s12 = smov %s1135_s13 }
 0x25c   : > { %s1490_s13 = smov %s1139_s14  ;;  %s1491_s14 = smov %s1231_s24 }
 0x25d   : > { %s1492_s15 = smov %s1147_s16  ;;  %19 = sbr.rel (!%p17_p8) target bundleno = 9 (0x9), region = 100 }
 0x260   : > { %s1493_s16 = smov %s1488_s28 }
 0x264   :  { %679 = vsyncpa [#allocation4], 1 }
 0x265   :  { %681 = vsyncpa [#allocation4 + $0x1], 1 }
 0x266   :  { %682 = vsyncpa [#allocation7], 1 }
 0x267   :  { %683 = vsyncpa [#allocation5], 1 }
 0x268   :  { %685 = vsyncpa [#allocation5 + $0x1], 1 }

// kernel: tpu_custom_call.1
= control target key start
LH: loop header
LB: loop body
LE: loop exit
PB: predicated region body
PF: predicated region fallthrough
CT: control target
= control target key end

     0   :  { %s1457_s0 = inlined_call_operand.hbm [shape: f32[2,8,32], index: 0, kind: input, shape index: {}]   ;;  %s1458_s1 = inlined_call_operand.hbm [shape: bf16[40,512], index: 1, kind: input, shape index: {}]   ;;  %s1459_s2 = inlined_call_operand.hbm [shape: bf16[2,8,128], index: 2, kind: input, shape index: {}]   ;;  %s1460_s3 = inlined_call_operand.hbm [shape: bf16[2,4,8,8], index: 3, kind: output, shape index: {}]  }
   0x1   :  { %1469 = sst [smem:[#allocation15_spill]] %s1457_s0 }
   0x2   :  { %8 = vsyncpa [#allocation4], 0 }
   0x3   :  { %10 = vsyncpa [#allocation4 + $0x1], 0 }
   0x4   :  { %11 = vsyncpa [#allocation7], 0 }
   0x5   :  { %12 = vsyncpa [#allocation5], 0 }
   0x6   :  { %14 = vsyncpa [#allocation5 + $0x1], 0  ;;  %s1183_s12 = smov 0   ;;  %s1185_s13 = smov 0  }
   0x7   :  { %s1187_s14 = smov 0   ;;  %s1189_s15 = smov 0  }
   0x8   :  { %s1191_s16 = smov 0   ;;  %s1193_s17 = smov 0  }
   0x9 LB: > { %s46_s18 = sadd.s32 1, %s1147_s16  ;;  %s55_s19 = sadd.s32 1, %s1139_s14  ;;  %s1151_s17 = sphi %s1193_s17, %s20_s17   ;;  %s1147_s16 = sphi %s1191_s16, %s1493_s16   ;;  %s1143_s15 = sphi %s1189_s15, %s1492_s15   ;;  %s1139_s14 = sphi %s1187_s14, %s1491_s14   ;;  %s1135_s13 = sphi %s1185_s13, %s1490_s13   ;;  %s1131_s12 = sphi %s1183_s12, %s1489_s12  }
   0xa   : > { %p48_p0 = scmp.ge.s32.totalorder %s46_s18, 2  ;;  %p62_p1 = scmp.ne.s32.totalorder %s1139_s14, %s1135_s13 }
   0xb   : > { %p63_p2 = scmp.eq.s32.totalorder %s1151_s17, 0  ;;  %p905_p5 = scmp.lt.s32.totalorder %s1151_s17, 2 }
   0xc   : > { %s1495_s18 = smov (%p48_p0, %s46_s18), 0  ;;  %s194_s21 = sand.u32 1, %s1151_s17  }
   0xd   : > { %1470 = sst [smem:[#allocation14_spill]] %s1495_s18  ;;  %p64_p4 = por %p63_p2, %p62_p1 }
   0xe   : > { %s50_s20 = ssub.s32 %s1147_s16, %s1495_s18  ;;  %s196_s22 = sand.u32 1, %s1139_s14  }
   0xf   : > { %p53_p6 = scmp.eq.s32.totalorder %s50_s20, 0  ;;  %s790_s23 = sshll.u32 %s1147_s16, 7 }
  0x10   : > { %s789_s25 = sshll.u32 %s196_s22, 3  ;;  %s1471_s0 = sld [smem:[#allocation15_spill]] }
  0x11   : > { %s1231_s24 = scalar_select %p53_p6, %s1139_s14, %s55_s19  }
  0x12   : > { %p1240_p7 = pnand %p905_p5, %p64_p4  ;;  %s198_s30 = scalar_lea.vmem [#allocation3], %s789_s25 }
  0x13   : > { %s206_s4 = sshll.u32 %s198_s30, 4  ;;  %s1246_s5 = scalar_lea.sflag [#allocation4], %s194_s21  ;;  %s1244_s4 = int_to_ptr.vmem [resolvable:$true] %s206_s4 }
  0x14   : > { %s1472_s29 = scalar_select %p1240_p7, 1, 0 }
  0x15   : > { %p1463_p9 = pneg %p1240_p7 }
  0x16   : > { %s1238_s28 = scalar_lea.hbm %s1471_s0, %s790_s23  ;;  %s978_s9 = scalar_lea.hbm %s1471_s0, 256 }
  0x17   : > { %s973_s6 = scalar_lea.hbm %s1238_s28, 128  ;;  %p979_p12 = scmp.lt.u32.totalorder %s1238_s28, %s1471_s0 }
  0x18   : > { %p974_p8 = scmp.ne.s32.totalorder %s1238_s28, %s973_s6  ;;  %p980_p13 = scmp.lt.u32.totalorder %s978_s9, %s973_s6 }
  0x19   : > { %p982_p2 = scmp.lt.u32.totalorder %s973_s6, %s1238_s28 }
  0x1a   : > { %p976_p10 = pnand %p1463_p9, %p974_p8  ;;  %p981_p0 = por %p980_p13, %p979_p12 }
  0x1c   : > { %p977_p11 = pneg %p976_p10  ;;  %p983_p4 = por %p982_p2, %p981_p0 }
  0x1e   : > { %p984_p5 = pnand %p983_p4, %p977_p11 }
  0x20   : > { %987 = shalt.err (!%p984_p5)
}
  0x21   : > { %s988_s19 = scalar_lea.vmem %s1244_s4, 128  ;;  %s1153_s20 = smov [#allocation3]  }
  0x22   : > { %p989_p6 = scmp.ne.s32.totalorder %s1244_s4, %s988_s19  ;;  %s993_s21 = sshll.u32 %s1153_s20, 4  ;;  %s994_s21 = int_to_ptr.vmem [resolvable:$false] %s993_s21 }
  0x23   : > { %s995_s23 = scalar_lea.vmem %s994_s21, 256  ;;  %p996_p3 = scmp.lt.s32.totalorder %s1244_s4, %s994_s21 }
  0x24   : > { %p991_p8 = pnand %p989_p6, %p1463_p9  ;;  %p997_p12 = scmp.lt.s32.totalorder %s995_s23, %s988_s19 }
  0x26   : > { %p992_p10 = pneg %p991_p8  ;;  %p998_p13 = por %p997_p12, %p996_p3 }
  0x28   : > { %p999_p0 = pnand %p998_p13, %p992_p10 }
  0x2a   : > { %1002 = shalt.err (!%p999_p0)
}
  0x2b   : > { %896 = dma.hbm_to_vmem [thread:$0]  (!%p1240_p7), %s1238_s28, 128, %s1244_s4, %s1246_s5  }
  0x2c   : > { %s1275_s25 = sadd.s32 4294967295, %s1151_s17   ;;  %s785_s26 = sadd.s32 4294967294, %s1151_s17  }
  0x2d   : > { %p68_p3 = scmp.ne.s32.totalorder %s1135_s13, %s1131_s12  ;;  %p1462_p11 = scmp.eq.s32.totalorder %s1275_s25, 0 }
  0x2e   : > { %p152_p2 = scmp.eq.s32.totalorder %s1275_s25, 1  ;;  %p158_p4 = scmp.eq.s32.totalorder %s785_s26, 1 }
  0x2f   : > { %p1284_p5 = por %p1462_p11, %p68_p3  ;;  %p786_p6 = scmp.ge.s32.totalorder %s1151_s17, 1 }
  0x30   : > { %p1292_p8 = por %p152_p2, %p62_p1  ;;  %p1296_p10 = por %p158_p4, %p68_p3 }
  0x31   : > { %s1473_s27 = scalar_select %p1284_p5, 1, 0 }
  0x32   : > { %s1474_s28 = scalar_select %p1292_p8, 1, 0 }
  0x33   : > { %s1475_s30 = scalar_select %p1296_p10, 1, 0 }
  0x34   : > { %p165_p12 = scmp.lt.s32.totalorder %s1151_s17, 3  ;;  %s791_s4 = sshll.u32 %s196_s22, 2 }
  0x35   : > { %s1154_s7 = smov [#allocation6]   ;;  %s792_s9 = sshll.u32 %s1147_s16, 6 }
  0x36   : > { %p1303_p13 = pnand %p786_p6, %p165_p12  ;;  %s180_s8 = sshll.u32 %s1154_s7, 4  ;;  %s1307_s8 = int_to_ptr.vmem [resolvable:$true] %s180_s8 }
  0x37   : > { %s217_s10 = scalar_lea.vmem [#allocation8], %s791_s4  ;;  %s1321_s21 = scalar_lea.hbm %s1459_s2, %s792_s9 }
  0x38   : > { %s1476_s6 = scalar_select %p1303_p13, 1, 0 }
  0x39   : > { %p889_p1 = pneg %p1303_p13  ;;  %s225_s11 = sshll.u32 %s217_s10, 4  ;;  %s1323_s11 = int_to_ptr.vmem [resolvable:$true] %s225_s11 }
  0x3a   : > { %s1003_s7 = scalar_lea.hbm %s1458_s1, 1280 }
  0x3b   : > { %p1314_p0 = pnand %p889_p1, %p1462_p11  ;;  %p1004_p3 = scmp.ne.s32.totalorder %s1458_s1, %s1003_s7 }
  0x3c   : > { %p1010_p12 = scmp.lt.u32.totalorder %s1003_s7, %s1458_s1 }
  0x3d   : > { %p1005_p2 = pneg %p1314_p0 }
  0x3f   : > { %p1006_p4 = pnand %p1005_p2, %p1004_p3 }
  0x41   : > { %p1007_p6 = pneg %p1006_p4 }
  0x43   : > { %p1012_p1 = pnand %p1010_p12, %p1007_p6 }
  0x45   : > { %1015 = shalt.err (!%p1012_p1)
}
  0x46   : > { %s1016_s9 = scalar_lea.vmem %s1307_s8, 1280  ;;  %p1024_p8 = scmp.lt.s32.totalorder %s1307_s8, %s1307_s8 }
  0x47   : > { %p1017_p11 = scmp.ne.s32.totalorder %s1307_s8, %s1016_s9  ;;  %p1025_p5 = scmp.lt.s32.totalorder %s1016_s9, %s1016_s9 }
  0x49   : > { %p1019_p9 = pnand %p1017_p11, %p1005_p2  ;;  %p1026_p13 = por %p1025_p5, %p1024_p8 }
  0x4b   : > { %p1020_p10 = pneg %p1019_p9 }
  0x4d   : > { %p1027_p7 = pnand %p1026_p13, %p1020_p10 }
  0x4f   : > { %1030 = shalt.err (!%p1027_p7)
}
  0x50   : > { %s1155_s0 = smov 256   ;;  %s1156_s18 = smov 16  }
  0x51   : > { %892 = dma.hbm_to_vmem [thread:$0]  (!%p1314_p0), %s1458_s1, 1280, %s1307_s8, [#allocation7], %s1155_s0, %s1155_s0, %s1156_s18  }
  0x52   : > { %s1031_s23 = scalar_lea.hbm %s1321_s21, 64  ;;  %p1478_p11 = scmp.ne.s32.totalorder %s1472_s29, 0 }
  0x53   : > { %p1032_p9 = scmp.ne.s32.totalorder %s1321_s21, %s1031_s23  ;;  %s1036_s4 = scalar_lea.hbm %s1459_s2, 128 }
  0x54   : > { %p1479_p5 = pneg %p1478_p11  ;;  %p1037_p10 = scmp.lt.u32.totalorder %s1321_s21, %s1459_s2 }
  0x55   : > { %p1038_p13 = scmp.lt.u32.totalorder %s1036_s4, %s1031_s23  ;;  %p1040_p2 = scmp.lt.u32.totalorder %s1031_s23, %s1321_s21 }
  0x56   : > { %p1034_p8 = pnand %p1032_p9, %p1479_p5 }
  0x57   : > { %p1039_p3 = por %p1038_p13, %p1037_p10 }
  0x58   : > { %p1035_p7 = pneg %p1034_p8 }
  0x59   : > { %p1041_p4 = por %p1040_p2, %p1039_p3 }
  0x5b   : > { %p1042_p6 = pnand %p1041_p4, %p1035_p7 }
  0x5d   : > { %1045 = shalt.err (!%p1042_p6)
}
  0x5e   : > { %s1046_s8 = scalar_lea.vmem %s1323_s11, 64  ;;  %p1480_p12 = pmov %p1479_p5 }
  0x5f   : > { %p1047_p0 = scmp.ne.s32.totalorder %s1323_s11, %s1046_s8  ;;  %s1157_s19 = smov [#allocation8]  }
  0x60   : > { %s1051_s0 = sshll.u32 %s1157_s19, 4  ;;  %s1052_s0 = int_to_ptr.vmem [resolvable:$false] %s1051_s0 }
  0x61   : > { %p1049_p1 = pnand %p1047_p0, %p1480_p12  ;;  %s1053_s18 = scalar_lea.vmem %s1052_s0, 128 }
  0x62   : > { %p1054_p5 = scmp.lt.s32.totalorder %s1323_s11, %s1052_s0  ;;  %p1055_p8 = scmp.lt.s32.totalorder %s1053_s18, %s1046_s8 }
  0x63   : > { %p1050_p9 = pneg %p1049_p1 }
  0x64   : > { %p1056_p10 = por %p1055_p8, %p1054_p5 }
  0x66   : > { %p1057_p13 = pnand %p1056_p10, %p1050_p9 }
  0x68   : > { %1060 = shalt.err (!%p1057_p13)
}
  0x69   : > { %899 = dma.hbm_to_vmem [thread:$0]  (!%p1478_p11), %s1321_s21, 64, %s1323_s11, %s1246_s5  }
  0x6a   : > { %p1481_p7 = scmp.ne.s32.totalorder %s1476_s6, 0 }
  0x6b   : > { %s236_s22 = sand.u32 (!%p1481_p7), 1, %s1275_s25   ;;  %s1374_s20 = sand.u32 (!%p1481_p7), 1, %s1135_s13  }
  0x6c   : > { %234 = sbr.rel (%p1481_p7) target bundleno = 596 (0x254), region = 32  ;;  %s794_s23 = sshll.u32 (!%p1481_p7), %s1374_s20, 3 }
  0x6d   : > { %s237_s26 = scalar_lea.sflag (!%p1481_p7), [#allocation4], %s236_s22  ;;  %s240_s7 = scalar_lea.vmem (!%p1481_p7), [#allocation3], %s794_s23 }
  0x6e   : > { %p1482_p3 = scmp.ne.s32.totalorder (!%p1481_p7), %s1473_s27, 0 }
  0x73   : > { %1114 = dma.done.wait (%p1482_p3), %s237_s26, 128  }
  0x74   : > { %1116 = vsyncadd (%p1482_p3), %s237_s26, 4294967168  ;;  %p1483_p11 = scmp.eq.s32.totalorder %s1275_s25, 0 }
  0x76   : > { %1118 = dma.done.wait (%p1483_p11), [#allocation7], 1280   ;;  %p1484_p2 = pmov %p1483_p11 }
  0x77   : > { %s796_s29 = sshll.u32 %s1374_s20, 2 }
  0x78   : > { %1120 = vsyncadd (%p1484_p2), [#allocation7], 4294966016  ;;  %s1386_s5 = scalar_lea.vmem [#allocation8], %s796_s29 }
  0x79   : > { %1122 = dma.done.wait (%p1482_p3), %s237_s26, 64  }
  0x7a   : > { %1124 = vsyncadd (%p1482_p3), %s237_s26, 4294967232  ;;  %v1158_v0 = vmov 0.0   ;;  %vm1159_vm0 = vmmov 0   ;;  %v963_v1 = vld [vmem:[#allocation6] ss:$16 sps:$4 sm:$0xff]   ;;  %vm312_vm1 = vcmask 261120   ;;  %v296_v12 = vlaneseq }
  0x7b   : > { %841 = vmatprep.subr.bf16.mxu0 %v1158_v0  ;;  %849 = vmatprep.subr.bf16.mxu1 %v1158_v0  ;;  %v964_v2 = vld [vmem:[#allocation6 + $0x4] ss:$16 sps:$4 sm:$0xff]   ;;  %v965_v3 = vld [vmem:[#allocation6 + $0x20] ss:$16 sps:$4 sm:$0xff]   ;;  %v967_v7 = vld [vmem:[#allocation6 + $0x8] ss:$16 sps:$4 sm:$0xff]  }
  0x7c   : > { %845 = vmatprep.mubr.msk.bf16.mxu0 %vm1159_vm0, %v1158_v0  ;;  %853 = vmatprep.mubr.msk.bf16.mxu1 %vm1159_vm0, %v1158_v0  ;;  %v966_v4 = vld [vmem:[#allocation6 + $0x24] ss:$16 sps:$4 sm:$0xff]   ;;  %v968_v8 = vld [vmem:[#allocation6 + $0xc] ss:$16 sps:$4 sm:$0xff]   ;;  %v969_v9 = vld [vmem:[#allocation6 + $0x28] ss:$16 sps:$4 sm:$0xff]  }
  0x7d   : > { %842 = vmatpush3.bf16.msra.mxu0 %v963_v1  ;;  %850 = vmatpush3.bf16.msra.mxu1 %v964_v2  ;;  %v288_v5 = vld [vmem:[%s240_s7] sm:$0xff]  ;;  %v297_v13 = vshrl.u32 %v296_v12, 7  ;;  %v294_v14 = vld [vmem:[#allocation6 + $0x40] sm:$0x1]  ;;  %v362_v15 = vld [vmem:[#allocation6 + $0x44] sm:$0x1] }
  0x7e   : > { %843 = vmatprep.subr.bf16.mxu0 %v1158_v0  ;;  %851 = vmatprep.subr.bf16.mxu1 %v1158_v0  ;;  %v289_v6 = vpack.c.bf16 %v288_v5, %v288_v5  ;;  %v970_v10 = vld [vmem:[#allocation6 + $0x2c] ss:$16 sps:$4 sm:$0xff]   ;;  %v557_v11 = vld [vmem:[%s1386_s5] sm:$0xf]  ;;  %v295_v16 = vunpack.c.l.bf16 %v294_v14  ;;  %v363_v18 = vunpack.c.l.bf16 %v362_v15  ;;  %v427_v21 = vld [vmem:[#allocation6 + $0x48] sm:$0x1] }
  0x7f   : > { %v298_v17 = vsub.s32 0, %v297_v13  ;;  %v492_v22 = vld [vmem:[#allocation6 + $0x4c] sm:$0x1]  ;;  %v428_v27 = vunpack.c.l.bf16 %v427_v21  ;;  %s797_s25 = sshll.u32 %s1374_s20, 4  ;;  %vm635_vm2 = vcmask 60416   ;;  %s825_s11 = sshll.u32 %s1143_s15, 8 }
  0x80   : > { %v493_v31 = vunpack.c.l.bf16 %v492_v22  ;;  %s280_s27 = scalar_lea.vmem [#allocation9], %s797_s25  ;;  %s1408_s10 = scalar_lea.hbm %s1460_s3, %s825_s11 }
  0x81   : > { %844 = vmatpush3.bf16.msra.mxu0 %v965_v3  ;;  %852 = vmatpush3.bf16.msra.mxu1 %v966_v4  ;;  %v299_v19 = vrot.slane %v295_v16, %v298_v17  ;;  %v367_v20 = vrot.slane %v363_v18, %v298_v17  ;;  %v432_v37 = vrot.slane %v428_v27, %v298_v17  ;;  %s658_s6 = sshll.u32 %s280_s27, 4  ;;  %s641_s15 = scalar_lea.sflag [#allocation5], %s1374_s20  ;;  %s1403_s6 = int_to_ptr.vmem [resolvable:$true] %s658_s6 }
  0x82   : > { %857 = vmatprep.subr.bf16.mxu0 %v1158_v0  ;;  %865 = vmatprep.subr.bf16.mxu1 %v1158_v0  ;;  %v497_v38 = vrot.slane %v493_v31, %v298_v17  ;;  %s1061_s9 = scalar_lea.vmem %s1403_s6, 256  ;;  %p1485_p6 = scmp.ne.s32.totalorder %s1474_s28, 0 }
  0x83   : > { %p1062_p4 = scmp.ne.s32.totalorder %s1403_s6, %s1061_s9  ;;  %s1160_s8 = smov [#allocation9]  }
  0x84   : > { %846 = vmatmul.mubr.msk.bf16.vlgmr.msra.gmra.mrb[0].mxu0 %vm312_vm1, %v289_v6  ;;  %854 = vmatmul.mubr.msk.bf16.vlgmr.msra.gmra.mrb[0].mxu1 %vm312_vm1, %v289_v6  ;;  %s1065_s19 = sshll.u32 %s1160_s8, 4  ;;  %s1066_s19 = int_to_ptr.vmem [resolvable:$false] %s1065_s19 }
  0x85   : > { %858 = vmatpush3.bf16.msra.mxu0 %v967_v7  ;;  %866 = vmatpush3.bf16.msra.mxu1 %v968_v8  ;;  %p1063_p0 = pnand %p1062_p4, %p1485_p6  ;;  %s1067_s0 = scalar_lea.vmem %s1066_s19, 512 }
  0x86   : > { %859 = vmatprep.subr.bf16.mxu0 %v1158_v0  ;;  %867 = vmatprep.subr.bf16.mxu1 %v1158_v0  ;;  %p1068_p1 = scmp.lt.s32.totalorder %s1403_s6, %s1066_s19  ;;  %p1069_p9 = scmp.lt.s32.totalorder %s1067_s0, %s1061_s9 }
  0x87   : > { %861 = vmatprep.mubr.msk.bf16.mxu0 %vm1159_vm0, %v1158_v0  ;;  %869 = vmatprep.mubr.msk.bf16.mxu1 %vm1159_vm0, %v1158_v0  ;;  %p1064_p12 = pneg %p1063_p0 }
  0x88   : > { %p1070_p5 = por %p1069_p9, %p1068_p1 }
  0x89   : > { %860 = vmatpush3.bf16.msra.mxu0 %v969_v9  ;;  %868 = vmatpush3.bf16.msra.mxu1 %v970_v10 }
  0x8a   : > { %873 = vmatprep.subr.bf16.mxu0 %v557_v11  ;;  %p1071_p8 = pnand %p1070_p5, %p1064_p12 }
  0x8c   : > { %862 = vmatmul.mubr.msk.bf16.vlgmr.msra.gmra.mrb[4].mxu0 %vm312_vm1, %v289_v6  ;;  %870 = vmatmul.mubr.msk.bf16.vlgmr.msra.gmra.mrb[4].mxu1 %vm312_vm1, %v289_v6 }
  0x92   : > { %874 = vmatpush3.bf16.xpose.msra.mxu0 %v557_v11 }
 0x157   : > { %v350_v23 = vpop.f32.mrb[0].mxu0  ;;  %v414_v25 = vpop.f32.mrb[0].mxu1 }
 0x158   : > { %v351_v24 = vadd.f32 %v350_v23, %v299_v19  ;;  %v847_v26 = vpop.f32.mrb[1].mxu0  ;;  %v415_v28 = vadd.f32 %v414_v25, %v367_v20  ;;  %v855_v29 = vpop.f32.mrb[1].mxu1 }
 0x159   : > { %v353_v30 = vpop.f32.mrb[2].mxu0  ;;  %v417_v33 = vpop.f32.mrb[2].mxu1 }
 0x15a   : > { %v356_v32 = vpack.c.bf16 %v351_v24, %v351_v24  ;;  %v848_v34 = vpop.f32.mrb[3].mxu0  ;;  %v420_v35 = vpack.c.bf16 %v415_v28, %v415_v28  ;;  %v856_v36 = vpop.f32.mrb[3].mxu1 }
 0x15c   : > { %357 = vst [vmem:[#allocation2] sm:$0xf] %v356_v32  ;;  %422 = vst [vmem:[#allocation2 + $0x4] sm:$0xf] %v420_v35 }
 0x15f   : > { %v479_v39 = vpop.f32.mrb[4].mxu0  ;;  %v544_v41 = vpop.f32.mrb[4].mxu1 }
 0x160   : > { %v480_v40 = vadd.f32 %v479_v39, %v432_v37  ;;  %v863_v42 = vpop.f32.mrb[5].mxu0  ;;  %v545_v43 = vadd.f32 %v544_v41, %v497_v38  ;;  %v871_v44 = vpop.f32.mrb[5].mxu1 }
 0x161   : > { %v482_v45 = vpop.f32.mrb[6].mxu0  ;;  %v547_v47 = vpop.f32.mrb[6].mxu1 }
 0x162   : > { %v485_v46 = vpack.c.bf16 %v480_v40, %v480_v40  ;;  %v864_v48 = vpop.f32.mrb[7].mxu0  ;;  %v550_v49 = vpack.c.bf16 %v545_v43, %v545_v43  ;;  %v872_v50 = vpop.f32.mrb[7].mxu1 }
 0x163   : > { %v971_v51 = vld [vmem:[#allocation2] sm:$0xff]  }
 0x164   : > { %487 = vst [vmem:[#allocation2 + $0x8] sm:$0xf] %v485_v46  ;;  %552 = vst [vmem:[#allocation2 + $0xc] sm:$0xf] %v550_v49  ;;  %875 = vmatprep.mubr.bf16.mxu0 %v971_v51 }
 0x16b   : > { %v972_v52 = vld [vmem:[#allocation2 + $0x8] sm:$0xff]  }
 0x16c   : > { %876 = vmatmul.mubr.bf16.vlgmr.msra.gmra.mrb[8].mxu0 %v972_v52 }
 0x23f   : > { %v877_v53 = vpop.f32.mrb[8].mxu0 }
 0x240   : > { %v823_v54 = vpack.c.bf16 %v877_v53, %v877_v53  ;;  %v604_v55 = vpop.f32.mrb[9].mxu0 }
 0x241   : > { %v821_v56 = vpack.c.bf16 %v604_v55, %v604_v55  ;;  %v878_v57 = vpop.f32.mrb[10].mxu0 }
 0x242   : > { %638 = vst.msk [vmem:[%s280_s27 + $0x8] sm:$0xf] %vm635_vm2, %v823_v54  ;;  %v824_v58 = vpack.c.bf16 %v878_v57, %v878_v57  ;;  %v607_v59 = vpop.f32.mrb[11].mxu0 }
 0x243   : > { %636 = vst.msk [vmem:[%s280_s27] sm:$0xf] %vm635_vm2, %v821_v56  ;;  %v822_v60 = vpack.c.bf16 %v607_v59, %v607_v59 }
 0x244   : > { %639 = vst.msk [vmem:[%s280_s27 + $0xc] sm:$0xf] %vm635_vm2, %v824_v58 }
 0x245   : > { %637 = vst.msk [vmem:[%s280_s27 + $0x4] sm:$0xf] %vm635_vm2, %v822_v60 }
 0x246   : > { %1074 = shalt.err (!%p1071_p8)
}
 0x247   : > { %s1075_s18 = scalar_lea.hbm %s1408_s10, 256  ;;  %s1079_s26 = scalar_lea.hbm %s1460_s3, 512 }
 0x248   : > { %p1076_p10 = scmp.ne.s32.totalorder %s1408_s10, %s1075_s18  ;;  %p1080_p3 = scmp.lt.u32.totalorder %s1408_s10, %s1460_s3 }
 0x249   : > { %p1081_p11 = scmp.lt.u32.totalorder %s1079_s26, %s1075_s18  ;;  %p1083_p4 = scmp.lt.u32.totalorder %s1075_s18, %s1408_s10 }
 0x24a   : > { %p1077_p13 = pnand %p1076_p10, %p1485_p6 }
 0x24b   : > { %p1082_p2 = por %p1081_p11, %p1080_p3 }
 0x24c   : > { %p1078_p7 = pneg %p1077_p13 }
 0x24d   : > { %p1084_p0 = por %p1083_p4, %p1082_p2 }
 0x24f   : > { %p1085_p12 = pnand %p1084_p0, %p1078_p7 }
 0x251   : > { %1088 = shalt.err (!%p1085_p12)
}
 0x252   : > { %s1161_s5 = smov 64   ;;  %s1162_s25 = smov 4  }
 0x253   : > { %887 = dma.vmem_to_hbm [thread:$0]  (%p1485_p6), %s1403_s6, 256, %s1408_s10, %s641_s15, %s1161_s5, %s1161_s5, %s1162_s25  }
 0x254 PF: > { %s673_s27 = sand.u32 1, %s1131_s12   ;;  %p1486_p1 = scmp.ne.s32.totalorder %s1475_s30, 0 }
 0x255   : > { %p1487_p9 = scmp.ge.s32.totalorder %s1151_s17, 2  ;;  %s674_s11 = scalar_lea.sflag [#allocation5], %s673_s27 }
 0x257   : > { %p901_p5 = pnand %p1487_p9, %p1486_p1 }
 0x259   : > { %1126 = dma.done.wait (!%p901_p5), %s674_s11, 256  }
 0x25a   : > { %1128 = vsyncadd (!%p901_p5), %s674_s11, 4294967040  ;;  %s20_s17 = sadd.s32 1, %s1151_s17   ;;  %s1488_s28 = sld [smem:[#allocation14_spill]] }
 0x25b   : > { %p17_p8 = scmp.ge.s32.totalorder %s20_s17, 4   ;;  %s1489_s12 = smov %s1135_s13 }
 0x25c   : > { %s1490_s13 = smov %s1139_s14  ;;  %s1491_s14 = smov %s1231_s24 }
 0x25d   : > { %s1492_s15 = smov %s1147_s16  ;;  %19 = sbr.rel (!%p17_p8) target bundleno = 9 (0x9), region = 100 }
 0x260   : > { %s1493_s16 = smov %s1488_s28 }
 0x264   :  { %679 = vsyncpa [#allocation4], 1 }
 0x265   :  { %681 = vsyncpa [#allocation4 + $0x1], 1 }
 0x266   :  { %682 = vsyncpa [#allocation7], 1 }
 0x267   :  { %683 = vsyncpa [#allocation5], 1 }
 0x268   :  { %685 = vsyncpa [#allocation5 + $0x1], 1 }

</bundles_post_ra>
